<compile_context>
chip_gen: v6e
topology: v6e:2x2x1
jax: 0.10.0
libtpu: 0.0.40
codegen_flags: <defaults>
</compile_context>

<pallas_src>
import jax
import jax.numpy as jnp
from jax.experimental import pallas as pl
from jax.experimental.pallas import tpu as pltpu


def _savg_tmax_fc_kernel(x_ref, w_ref, b_ref, o_ref):
    # x_ref: (N_b, T, C, HW)   w_ref: (C, Kp)  (pre-scaled by 1/HW, K padded)
    # b_ref: (1, Kp)           o_ref: (N_b, Kp)
    _, t, _, hw = x_ref.shape

    feat = None
    for ti in range(t):                       # static, small unroll over segments
        xs = x_ref[:, ti, :, :]               # (N_b, C, HW) -- single slice live at a time
        if hw % 128 == 0 and hw > 128:
            # Pre-add the HW/128 lane groups on the VALU (free slot here), then
            # a single cross-lane (XLU) reduce of the 128-wide partial.
            part = xs[..., 0:128].astype(jnp.float32)
            for g in range(1, hw // 128):
                part = part + xs[..., g * 128:(g + 1) * 128].astype(jnp.float32)
            pooled = jnp.sum(part, axis=-1)                    # (N_b, C) f32
        else:
            pooled = jnp.sum(xs, axis=-1, dtype=jnp.float32)   # fused f32 accumulation
        feat = pooled if feat is None else jnp.maximum(feat, pooled)  # running max over T

    logits = jnp.dot(feat, w_ref[...], preferred_element_type=jnp.float32)  # MXU (N_b,C)x(C,Kp)
    o_ref[...] = (logits + b_ref[...]).astype(o_ref.dtype)


def _tpu_vmem_capacity_bytes():
    try:
        return int(pltpu.get_tpu_info().vmem_capacity_bytes)
    except Exception:
        return 64 << 20  # conservative (v7x-sized) fallback


def _pick_block_n(n, per_sample_bytes, *, target_block_bytes, min_steps):
    """Largest block_n honoring both the per-block byte target and a minimum
    number of grid steps (so the pipeline actually double-buffers)."""
    by_bytes = max(1, target_block_bytes // max(1, per_sample_bytes))
    by_steps = max(1, -(-n // min_steps))  # cdiv(n, min_steps)
    return int(max(1, min(by_bytes, by_steps, n)))


def savg_drop_tmax_cls(x, fc_w, fc_b, *, num_segments, num_features, block_n=None):
    """x: (nt, chw); fc_w: (K, C) like torch.nn.Linear; fc_b: (K,). Returns (n, K) f32.

    x may be float32 or bfloat16 (pool/max/matmul accumulate in f32)."""
    nt, chw = x.shape
    assert nt % num_segments == 0, "nt must be divisible by num_segments"
    assert chw % num_features == 0, "chw must be divisible by num_features"
    hw = chw // num_features
    n = nt // num_segments
    t = num_segments
    c = num_features
    k = fc_w.shape[0]

    # --- generation-aware sizing ---------------------------------------------
    vmem_cap = _tpu_vmem_capacity_bytes()
    small_vmem = vmem_cap <= (64 << 20)            # v7x-class: 64 MiB / TC, 2 TCs
    num_cores = 2 if small_vmem else 1
    target_block_bytes = (4 << 20) if small_vmem else (8 << 20)
    min_steps = 8 if small_vmem else 4
    clamp_max = (48 << 20) if small_vmem else (96 << 20)

    per_sample_bytes = t * c * hw * x.dtype.itemsize
    if block_n is None:
        block_n = _pick_block_n(n, per_sample_bytes,
                                target_block_bytes=target_block_bytes,
                                min_steps=min_steps)

    n_blocks = -(-n // block_n)                    # cdiv
    if num_cores == 2 and n_blocks > 1 and n_blocks % 2 == 1:
        n_blocks += 1                              # even split across the 2 TensorCores
    n_pad = n_blocks * block_n

    # --- prepare operands ------------------------------------------------------
    x_r = x.reshape(n, t, c, hw)                   # (N, T, C, HW)
    if n_pad != n:
        x_r = jnp.pad(x_r, ((0, n_pad - n), (0, 0), (0, 0), (0, 0)))

    k_pad = max(128, ((k + 127) // 128) * 128)     # lane-dense output / weight tile
    # Fold the 1/HW of AdaptiveAvgPool2d(1) into the weight (max over T commutes
    # with a positive constant scale; rounding order differs marginally from the
    # reference mean-then-matmul but stays within tolerance).
    w_scaled = fc_w.astype(jnp.float32).T * jnp.float32(1.0 / hw)        # (C, K)
    w_p = jnp.zeros((c, k_pad), jnp.float32).at[:, :k].set(w_scaled)     # (C, Kp)
    b_p = jnp.zeros((1, k_pad), jnp.float32).at[0, :k].set(fc_b.astype(jnp.float32))

    # --- VMEM budget (no f32 widened-copy term any more) ----------------------
    blk_in_bytes = block_n * per_sample_bytes
    w_bytes = c * k_pad * 4
    out_blk_bytes = block_n * k_pad * 4
    vmem_limit = (2 * blk_in_bytes                 # double-buffered input block
                  + 2 * (w_bytes + k_pad * 4)      # weight + bias (double-buffered)
                  + 2 * out_blk_bytes              # output block
                  + (8 << 20))                     # temporaries / compiler headroom
    vmem_limit = int(max(16 << 20, min(clamp_max, vmem_limit)))

    cost = pl.CostEstimate(
        flops=2 * n_pad * c * k_pad + n_pad * t * c * hw,
        transcendentals=0,
        bytes_accessed=(n_pad * t * c * hw * x.dtype.itemsize
                        + c * k_pad * 4 + k_pad * 4 + n_pad * k_pad * 4),
    )

    out = pl.pallas_call(
        _savg_tmax_fc_kernel,
        out_shape=jax.ShapeDtypeStruct((n_blocks, block_n, k_pad), jnp.float32),
        grid=(n_blocks,),
        in_specs=[
            pl.BlockSpec((block_n, t, c, hw), lambda i: (i, 0, 0, 0)),
            pl.BlockSpec((c, k_pad), lambda i: (0, 0)),
            pl.BlockSpec((1, k_pad), lambda i: (0, 0)),
        ],
        out_specs=pl.BlockSpec((None, block_n, k_pad), lambda i: (i, 0, 0)),
        compiler_params=pltpu.CompilerParams(
            dimension_semantics=("parallel",),
            vmem_limit_bytes=vmem_limit,
        ),
        cost_estimate=cost,
    )(x_r, w_p, b_p)

    return out.reshape(n_pad, k_pad)[:n, :k]


def _reference(x, fc_w, fc_b, *, num_segments, num_features):
    nt, chw = x.shape
    hw = chw // num_features
    n = nt // num_segments
    x_r = x.reshape(n, num_segments, num_features, hw).astype(jnp.float32)
    pooled = jnp.mean(x_r, axis=-1)          # (N, T, C)
    feat = jnp.max(pooled, axis=1)           # (N, C)
    return feat @ fc_w.T.astype(jnp.float32) + fc_b.astype(jnp.float32)


if __name__ == "__main__":
    # Small shapes consistent with the module's forward:
    num_segments = 8          # T
    num_features = 32         # C
    h = 16                    # spatial side -> hw = 256
    batch = 2                 # N  -> nt = batch * num_segments
    num_classes = 10          # K (fc output)

    nt = batch * num_segments
    chw = num_features * h * h

    key = jax.random.PRNGKey(0)
    kx, kw, kb = jax.random.split(key, 3)
    x = jax.random.normal(kx, (nt, chw), dtype=jnp.float32)
    fc_w = jax.random.normal(kw, (num_classes, num_features), dtype=jnp.float32) * 0.02
    fc_b = jax.random.normal(kb, (num_classes,), dtype=jnp.float32) * 0.01

    out = savg_drop_tmax_cls(x, fc_w, fc_b,
                             num_segments=num_segments,
                             num_features=num_features)
    out = jax.block_until_ready(out)

    ref = _reference(x, fc_w, fc_b,
                     num_segments=num_segments,
                     num_features=num_features)
    assert out.shape == (batch, num_classes)
    assert jnp.allclose(out, ref, atol=1e-4, rtol=1e-4), "mismatch vs reference"
    print("KERNEL_OK")
</pallas_src>

<mosaic_0001>
module attributes {stable_mosaic.version = 11 : i64} {
  func.func @_savg_tmax_fc_kernel(%arg0: i32, %arg1: memref<1x8x32x256xf32, #tpu.memory_space<vmem>>, %arg2: memref<32x128xf32, #tpu.memory_space<vmem>>, %arg3: memref<1x128xf32, #tpu.memory_space<vmem>>, %arg4: memref<1x1x128xf32, #tpu.memory_space<vmem>>) attributes {dimension_semantics = [#tpu.dimension_semantics<parallel>], iteration_bounds = array<i64: 2>, scalar_prefetch = 0 : i64, scratch_operands = 0 : i64, tpu.core_type = #tpu.core_type<tc>, window_params = [{transform_indices = @transform_0, window_bounds = array<i64: 1, 8, 32, 256>}, {pipeline_mode = #tpu.pipeline_mode<synchronous>, transform_indices = @transform_1, window_bounds = array<i64: 32, 128>}, {pipeline_mode = #tpu.pipeline_mode<synchronous>, transform_indices = @transform_2, window_bounds = array<i64: 1, 128>}, {transform_indices = @transform_3, window_bounds = array<i64: 1, 1, 128>}]} {
    %c0 = arith.constant 0 : index
    %c0_0 = arith.constant 0 : index
    %c0_1 = arith.constant 0 : index
    %c0_2 = arith.constant 0 : index
    %0 = vector.load %arg1[%c0, %c0_0, %c0_1, %c0_2] : memref<1x8x32x256xf32, #tpu.memory_space<vmem>>, vector<1x1x32x256xf32>
    %1 = vector.shape_cast %0 : vector<1x1x32x256xf32> to vector<1x32x256xf32>
    %2 = vector.extract_strided_slice %1 {offsets = [0, 0, 0], sizes = [1, 32, 128], strides = [1, 1, 1]} : vector<1x32x256xf32> to vector<1x32x128xf32>
    %3 = vector.extract_strided_slice %1 {offsets = [0, 0, 128], sizes = [1, 32, 128], strides = [1, 1, 1]} : vector<1x32x256xf32> to vector<1x32x128xf32>
    %4 = arith.addf %2, %3 : vector<1x32x128xf32>
    %cst = arith.constant dense<0.000000e+00> : vector<1x32xf32>
    %5 = vector.multi_reduction <add>, %4, %cst [2] : vector<1x32x128xf32> to vector<1x32xf32>
    %c0_3 = arith.constant 0 : index
    %c1 = arith.constant 1 : index
    %c0_4 = arith.constant 0 : index
    %c0_5 = arith.constant 0 : index
    %6 = vector.load %arg1[%c0_3, %c1, %c0_4, %c0_5] : memref<1x8x32x256xf32, #tpu.memory_space<vmem>>, vector<1x1x32x256xf32>
    %7 = vector.shape_cast %6 : vector<1x1x32x256xf32> to vector<1x32x256xf32>
    %8 = vector.extract_strided_slice %7 {offsets = [0, 0, 0], sizes = [1, 32, 128], strides = [1, 1, 1]} : vector<1x32x256xf32> to vector<1x32x128xf32>
    %9 = vector.extract_strided_slice %7 {offsets = [0, 0, 128], sizes = [1, 32, 128], strides = [1, 1, 1]} : vector<1x32x256xf32> to vector<1x32x128xf32>
    %10 = arith.addf %8, %9 : vector<1x32x128xf32>
    %cst_6 = arith.constant dense<0.000000e+00> : vector<1x32xf32>
    %11 = vector.multi_reduction <add>, %10, %cst_6 [2] : vector<1x32x128xf32> to vector<1x32xf32>
    %12 = arith.maximumf %5, %11 : vector<1x32xf32>
    %c0_7 = arith.constant 0 : index
    %c2 = arith.constant 2 : index
    %c0_8 = arith.constant 0 : index
    %c0_9 = arith.constant 0 : index
    %13 = vector.load %arg1[%c0_7, %c2, %c0_8, %c0_9] : memref<1x8x32x256xf32, #tpu.memory_space<vmem>>, vector<1x1x32x256xf32>
    %14 = vector.shape_cast %13 : vector<1x1x32x256xf32> to vector<1x32x256xf32>
    %15 = vector.extract_strided_slice %14 {offsets = [0, 0, 0], sizes = [1, 32, 128], strides = [1, 1, 1]} : vector<1x32x256xf32> to vector<1x32x128xf32>
    %16 = vector.extract_strided_slice %14 {offsets = [0, 0, 128], sizes = [1, 32, 128], strides = [1, 1, 1]} : vector<1x32x256xf32> to vector<1x32x128xf32>
    %17 = arith.addf %15, %16 : vector<1x32x128xf32>
    %cst_10 = arith.constant dense<0.000000e+00> : vector<1x32xf32>
    %18 = vector.multi_reduction <add>, %17, %cst_10 [2] : vector<1x32x128xf32> to vector<1x32xf32>
    %19 = arith.maximumf %12, %18 : vector<1x32xf32>
    %c0_11 = arith.constant 0 : index
    %c3 = arith.constant 3 : index
    %c0_12 = arith.constant 0 : index
    %c0_13 = arith.constant 0 : index
    %20 = vector.load %arg1[%c0_11, %c3, %c0_12, %c0_13] : memref<1x8x32x256xf32, #tpu.memory_space<vmem>>, vector<1x1x32x256xf32>
    %21 = vector.shape_cast %20 : vector<1x1x32x256xf32> to vector<1x32x256xf32>
    %22 = vector.extract_strided_slice %21 {offsets = [0, 0, 0], sizes = [1, 32, 128], strides = [1, 1, 1]} : vector<1x32x256xf32> to vector<1x32x128xf32>
    %23 = vector.extract_strided_slice %21 {offsets = [0, 0, 128], sizes = [1, 32, 128], strides = [1, 1, 1]} : vector<1x32x256xf32> to vector<1x32x128xf32>
    %24 = arith.addf %22, %23 : vector<1x32x128xf32>
    %cst_14 = arith.constant dense<0.000000e+00> : vector<1x32xf32>
    %25 = vector.multi_reduction <add>, %24, %cst_14 [2] : vector<1x32x128xf32> to vector<1x32xf32>
    %26 = arith.maximumf %19, %25 : vector<1x32xf32>
    %c0_15 = arith.constant 0 : index
    %c4 = arith.constant 4 : index
    %c0_16 = arith.constant 0 : index
    %c0_17 = arith.constant 0 : index
    %27 = vector.load %arg1[%c0_15, %c4, %c0_16, %c0_17] : memref<1x8x32x256xf32, #tpu.memory_space<vmem>>, vector<1x1x32x256xf32>
    %28 = vector.shape_cast %27 : vector<1x1x32x256xf32> to vector<1x32x256xf32>
    %29 = vector.extract_strided_slice %28 {offsets = [0, 0, 0], sizes = [1, 32, 128], strides = [1, 1, 1]} : vector<1x32x256xf32> to vector<1x32x128xf32>
    %30 = vector.extract_strided_slice %28 {offsets = [0, 0, 128], sizes = [1, 32, 128], strides = [1, 1, 1]} : vector<1x32x256xf32> to vector<1x32x128xf32>
    %31 = arith.addf %29, %30 : vector<1x32x128xf32>
    %cst_18 = arith.constant dense<0.000000e+00> : vector<1x32xf32>
    %32 = vector.multi_reduction <add>, %31, %cst_18 [2] : vector<1x32x128xf32> to vector<1x32xf32>
    %33 = arith.maximumf %26, %32 : vector<1x32xf32>
    %c0_19 = arith.constant 0 : index
    %c5 = arith.constant 5 : index
    %c0_20 = arith.constant 0 : index
    %c0_21 = arith.constant 0 : index
    %34 = vector.load %arg1[%c0_19, %c5, %c0_20, %c0_21] : memref<1x8x32x256xf32, #tpu.memory_space<vmem>>, vector<1x1x32x256xf32>
    %35 = vector.shape_cast %34 : vector<1x1x32x256xf32> to vector<1x32x256xf32>
    %36 = vector.extract_strided_slice %35 {offsets = [0, 0, 0], sizes = [1, 32, 128], strides = [1, 1, 1]} : vector<1x32x256xf32> to vector<1x32x128xf32>
    %37 = vector.extract_strided_slice %35 {offsets = [0, 0, 128], sizes = [1, 32, 128], strides = [1, 1, 1]} : vector<1x32x256xf32> to vector<1x32x128xf32>
    %38 = arith.addf %36, %37 : vector<1x32x128xf32>
    %cst_22 = arith.constant dense<0.000000e+00> : vector<1x32xf32>
    %39 = vector.multi_reduction <add>, %38, %cst_22 [2] : vector<1x32x128xf32> to vector<1x32xf32>
    %40 = arith.maximumf %33, %39 : vector<1x32xf32>
    %c0_23 = arith.constant 0 : index
    %c6 = arith.constant 6 : index
    %c0_24 = arith.constant 0 : index
    %c0_25 = arith.constant 0 : index
    %41 = vector.load %arg1[%c0_23, %c6, %c0_24, %c0_25] : memref<1x8x32x256xf32, #tpu.memory_space<vmem>>, vector<1x1x32x256xf32>
    %42 = vector.shape_cast %41 : vector<1x1x32x256xf32> to vector<1x32x256xf32>
    %43 = vector.extract_strided_slice %42 {offsets = [0, 0, 0], sizes = [1, 32, 128], strides = [1, 1, 1]} : vector<1x32x256xf32> to vector<1x32x128xf32>
    %44 = vector.extract_strided_slice %42 {offsets = [0, 0, 128], sizes = [1, 32, 128], strides = [1, 1, 1]} : vector<1x32x256xf32> to vector<1x32x128xf32>
    %45 = arith.addf %43, %44 : vector<1x32x128xf32>
    %cst_26 = arith.constant dense<0.000000e+00> : vector<1x32xf32>
    %46 = vector.multi_reduction <add>, %45, %cst_26 [2] : vector<1x32x128xf32> to vector<1x32xf32>
    %47 = arith.maximumf %40, %46 : vector<1x32xf32>
    %c0_27 = arith.constant 0 : index
    %c7 = arith.constant 7 : index
    %c0_28 = arith.constant 0 : index
    %c0_29 = arith.constant 0 : index
    %48 = vector.load %arg1[%c0_27, %c7, %c0_28, %c0_29] : memref<1x8x32x256xf32, #tpu.memory_space<vmem>>, vector<1x1x32x256xf32>
    %49 = vector.shape_cast %48 : vector<1x1x32x256xf32> to vector<1x32x256xf32>
    %50 = vector.extract_strided_slice %49 {offsets = [0, 0, 0], sizes = [1, 32, 128], strides = [1, 1, 1]} : vector<1x32x256xf32> to vector<1x32x128xf32>
    %51 = vector.extract_strided_slice %49 {offsets = [0, 0, 128], sizes = [1, 32, 128], strides = [1, 1, 1]} : vector<1x32x256xf32> to vector<1x32x128xf32>
    %52 = arith.addf %50, %51 : vector<1x32x128xf32>
    %cst_30 = arith.constant dense<0.000000e+00> : vector<1x32xf32>
    %53 = vector.multi_reduction <add>, %52, %cst_30 [2] : vector<1x32x128xf32> to vector<1x32xf32>
    %54 = arith.maximumf %47, %53 : vector<1x32xf32>
    %c0_31 = arith.constant 0 : index
    %c0_32 = arith.constant 0 : index
    %55 = vector.load %arg2[%c0_31, %c0_32] : memref<32x128xf32, #tpu.memory_space<vmem>>, vector<32x128xf32>
    %cst_33 = arith.constant dense<0.000000e+00> : vector<1x128xf32>
    %56 = tpu.matmul %54, %55, %cst_33 {dimension_numbers = #tpu.dot_dimension_numbers<[1], [0], [0], [1], [0, 0, 1, 1], [], []>} : vector<1x32xf32>, vector<32x128xf32>, vector<1x128xf32> -> vector<1x128xf32>
    %c0_34 = arith.constant 0 : index
    %c0_35 = arith.constant 0 : index
    %57 = vector.load %arg3[%c0_34, %c0_35] : memref<1x128xf32, #tpu.memory_space<vmem>>, vector<1x128xf32>
    %58 = arith.addf %56, %57 : vector<1x128xf32>
    %c0_36 = arith.constant 0 : index
    %c0_37 = arith.constant 0 : index
    %c0_38 = arith.constant 0 : index
    %59 = vector.load %arg4[%c0_36, %c0_37, %c0_38] : memref<1x1x128xf32, #tpu.memory_space<vmem>>, vector<1x1x128xf32>
    %60 = vector.shape_cast %59 : vector<1x1x128xf32> to vector<1x128xf32>
    %61 = vector.shape_cast %58 : vector<1x128xf32> to vector<1x1x128xf32>
    tpu.vector_store %arg4[%c0_36, %c0_37, %c0_38], %61 {strides = array<i32>} : memref<1x1x128xf32, #tpu.memory_space<vmem>>, vector<1x1x128xf32>,
    return
  }
  func.func @transform_0(%arg0: i32) -> (i32, i32, i32, i32) {
    %c0_i32 = arith.constant 0 : i32
    %c0_i32_0 = arith.constant 0 : i32
    %c0_i32_1 = arith.constant 0 : i32
    %c0_i32_2 = arith.constant 0 : i32
    return %arg0, %c0_i32, %c0_i32_0, %c0_i32_1 : i32, i32, i32, i32
  }
  func.func @transform_1(%arg0: i32) -> (i32, i32) {
    %c0_i32 = arith.constant 0 : i32
    %c0_i32_0 = arith.constant 0 : i32
    %c0_i32_1 = arith.constant 0 : i32
    return %c0_i32, %c0_i32_0 : i32, i32
  }
  func.func @transform_2(%arg0: i32) -> (i32, i32) {
    %c0_i32 = arith.constant 0 : i32
    %c0_i32_0 = arith.constant 0 : i32
    %c0_i32_1 = arith.constant 0 : i32
    return %c0_i32, %c0_i32_0 : i32, i32
  }
  func.func @transform_3(%arg0: i32) -> (i32, i32, i32) {
    %c0_i32 = arith.constant 0 : i32
    %c0_i32_0 = arith.constant 0 : i32
    %c0_i32_1 = arith.constant 0 : i32
    return %arg0, %c0_i32, %c0_i32_0 : i32, i32, i32
  }
}

</mosaic_0001>

<bundles_post_ra>
// kernel: tpu_custom_call.1
= control target key start
LH: loop header
LB: loop body
LE: loop exit
PB: predicated region body
PF: predicated region fallthrough
CT: control target
= control target key end

     0   :  { %8 = vsyncpa [#allocation3], 0  ;;  %s1139_s0 = inlined_call_operand.hbm [shape: f32[2,8,32,256], index: 0, kind: input, shape index: {}]   ;;  %s1140_s1 = inlined_call_operand.hbm [shape: f32[32,128], index: 1, kind: input, shape index: {}]   ;;  %s1141_s2 = inlined_call_operand.vmem [shape: f32[1,128], index: 2, kind: input, shape index: {}]   ;;  %s1142_s3 = inlined_call_operand.hbm [shape: f32[2,1,128], index: 3, kind: output, shape index: {}]  }
   0x1   :  { %10 = vsyncpa [#allocation3 + $0x1], 0 }
   0x2   :  { %11 = vsyncpa [#allocation6], 0 }
   0x3   :  { %12 = vsyncpa [#allocation4], 0 }
   0x4   :  { %14 = vsyncpa [#allocation4 + $0x1], 0  ;;  %s900_s12 = smov 0   ;;  %s902_s13 = smov 0  }
   0x5   :  { %s904_s14 = smov 0   ;;  %s906_s15 = smov 0  }
   0x6 LB: > { %s921_s16 = sadd.s32 4294967295, %s869_s15   ;;  %s597_s17 = sadd.s32 4294967294, %s869_s15   ;;  %s869_s15 = sphi %s906_s15, %s1164_s15   ;;  %s865_s14 = sphi %s904_s14, %s1163_s14   ;;  %s861_s13 = sphi %s902_s13, %s1162_s13   ;;  %s857_s12 = sphi %s900_s12, %s1161_s12  }
   0x7   : > { %p40_p0 = scmp.ne.s32.totalorder %s861_s13, %s857_s12  ;;  %p1143_p1 = scmp.eq.s32.totalorder %s921_s16, 0 }
   0x8   : > { %p112_p3 = scmp.eq.s32.totalorder %s597_s17, 1  ;;  %p598_p5 = scmp.ge.s32.totalorder %s869_s15, 1 }
   0x9   : > { %p930_p4 = por %p1143_p1, %p40_p0  ;;  %p119_p7 = scmp.lt.s32.totalorder %s869_s15, 3 }
   0xa   : > { %p935_p6 = por %p112_p3, %p40_p0  ;;  %s871_s21 = smov [#allocation5]  }
   0xb   : > { %s1147_s18 = scalar_select %p930_p4, 1, 0 }
   0xc   : > { %s1148_s19 = scalar_select %p935_p6, 1, 0 }
   0xd   : > { %p940_p8 = pnand %p598_p5, %p119_p7  ;;  %s131_s22 = sshll.u32 %s871_s21, 4  ;;  %s132_s22 = int_to_ptr.vmem [resolvable:$true] %s131_s22 }
   0xe   : > { %s954_s24 = sadd.s32 1, %s869_s15   ;;  %s27_s25 = sadd.s32 1, %s865_s14 }
   0xf   : > { %s1149_s20 = scalar_select %p940_p8, 1, 0 }
  0x10   : > { %p692_p9 = pneg %p940_p8  ;;  %s24_s26 = ssub.s32 %s869_s15, %s954_s24 }
  0x11   : > { %s758_s27 = scalar_lea.vmem %s132_s22, 512  ;;  %p766_p5 = scmp.lt.s32.totalorder %s132_s22, %s132_s22 }
  0x12   : > { %p949_p11 = pnand %p692_p9, %p1143_p1  ;;  %p759_p13 = scmp.ne.s32.totalorder %s132_s22, %s758_s27 }
  0x13   : > { %p767_p7 = scmp.lt.s32.totalorder %s758_s27, %s758_s27 }
  0x14   : > { %p749_p12 = pneg %p949_p11 }
  0x15   : > { %p768_p10 = por %p767_p7, %p766_p5 }
  0x16   : > { %p761_p0 = pnand %p759_p13, %p749_p12 }
  0x18   : > { %p762_p3 = pneg %p761_p0 }
  0x1a   : > { %p769_p2 = pnand %p768_p10, %p762_p3 }
  0x1c   : > { %772 = shalt.err (!%p769_p2)
}
  0x1d   : > { %s872_s28 = smov 128   ;;  %s873_s29 = smov 8  }
  0x1e   : > { %695 = dma.hbm_to_vmem [thread:$0]  (!%p949_p11), %s1140_s1, 512, %s132_s22, [#allocation6], %s872_s28, %s872_s28, %s873_s29  }
  0x1f   : > { %p25_p9 = scmp.eq.s32.totalorder %s24_s26, 0  ;;  %p34_p12 = scmp.ne.s32.totalorder %s865_s14, %s861_s13 }
  0x20   : > { %p35_p10 = scmp.eq.s32.totalorder %s869_s15, 0  ;;  %p705_p2 = scmp.lt.s32.totalorder %s869_s15, 2 }
  0x21   : > { %s971_s5 = scalar_select %p25_p9, %s865_s14, %s27_s25  }
  0x22   : > { %p36_p13 = por %p35_p10, %p34_p12  ;;  %p1151_p0 = scmp.eq.s32.totalorder %s921_s16, 1 }
  0x23   : > { %s148_s7 = sand.u32 1, %s865_s14   ;;  %s667_s8 = sshll.u32 %s869_s15, 13 }
  0x24   : > { %p975_p3 = por %p1151_p0, %p34_p12  ;;  %s601_s9 = sshll.u32 %s148_s7, 9 }
  0x25   : > { %s984_s17 = scalar_lea.hbm %s1139_s0, %s667_s8  ;;  %s152_s21 = scalar_lea.vmem [#allocation2], %s601_s9 }
  0x26   : > { %s1152_s6 = scalar_select %p975_p3, 1, 0 }
  0x27   : > { %s159_s22 = sshll.u32 %s152_s21, 4  ;;  %p986_p11 = pnand %p705_p2, %p36_p13  ;;  %s990_s22 = int_to_ptr.vmem [resolvable:$true] %s159_s22 }
  0x28   : > { %s992_s25 = scalar_lea.sflag [#allocation3], %s148_s7  ;;  %s773_s26 = scalar_lea.hbm %s984_s17, 8192 }
  0x29   : > { %p774_p5 = scmp.ne.s32.totalorder %s984_s17, %s773_s26  ;;  %p775_p7 = pneg %p986_p11 }
  0x2a   : > { %s778_s29 = scalar_lea.hbm %s1139_s0, 16384  ;;  %p779_p10 = scmp.lt.s32.totalorder %s984_s17, %s1139_s0 }
  0x2b   : > { %p776_p9 = pnand %p775_p7, %p774_p5  ;;  %p780_p2 = scmp.lt.s32.totalorder %s778_s29, %s773_s26 }
  0x2d   : > { %p777_p12 = pneg %p776_p9  ;;  %p781_p13 = por %p780_p2, %p779_p10 }
  0x2f   : > { %p782_p0 = pnand %p781_p13, %p777_p12 }
  0x31   : > { %785 = shalt.err (!%p782_p0)
}
  0x32   : > { %s786_s7 = scalar_lea.vmem %s990_s22, 8192  ;;  %s874_s8 = smov [#allocation2]  }
  0x33   : > { %p787_p1 = scmp.ne.s32.totalorder %s990_s22, %s786_s7  ;;  %s791_s9 = sshll.u32 %s874_s8, 4  ;;  %s792_s9 = int_to_ptr.vmem [resolvable:$false] %s791_s9 }
  0x34   : > { %s793_s10 = scalar_lea.vmem %s792_s9, 16384  ;;  %p794_p9 = scmp.lt.s32.totalorder %s990_s22, %s792_s9 }
  0x35   : > { %p789_p6 = pnand %p787_p1, %p775_p7  ;;  %p795_p3 = scmp.lt.s32.totalorder %s793_s10, %s786_s7 }
  0x37   : > { %p790_p5 = pneg %p789_p6  ;;  %p796_p4 = por %p795_p3, %p794_p9 }
  0x39   : > { %p797_p8 = pnand %p796_p4, %p790_p5 }
  0x3b   : > { %800 = shalt.err (!%p797_p8)
}
  0x3c   : > { %s875_s11 = smov 256   ;;  %s876_s21 = smov 16  }
  0x3d   : > { %699 = dma.hbm_to_vmem [thread:$0]  (!%p986_p11), %s984_s17, 8192, %s990_s22, %s992_s25, %s875_s11, %s875_s11, %s876_s21  }
  0x3e   : > { %p1154_p1 = scmp.ne.s32.totalorder %s1149_s20, 0 }
  0x3f   : > { %s1016_s26 = sand.u32 (!%p1154_p1), 1, %s861_s13   ;;  %p1155_p4 = scmp.ne.s32.totalorder (!%p1154_p1), %s1147_s18, 0 }
  0x40   : > { %171 = sbr.rel (%p1154_p1) target bundleno = 489 (0x1e9), region = 32  ;;  %s605_s27 = sshll.u32 (!%p1154_p1), %s1016_s26, 9 }
  0x41   : > { %s174_s28 = scalar_lea.sflag (!%p1154_p1), [#allocation3], %s1016_s26  ;;  %s1020_s29 = scalar_lea.vmem (!%p1154_p1), [#allocation2], %s605_s27 }
  0x45   : > { %844 = dma.done.wait (%p1155_p4), %s174_s28, 8192  }
  0x46   : > { %846 = vsyncadd (%p1155_p4), %s174_s28, 4294959104  ;;  %p1156_p6 = scmp.eq.s32.totalorder %s921_s16, 0 }
  0x48   : > { %848 = dma.done.wait (%p1156_p6), [#allocation6], 512   ;;  %p1157_p8 = pmov %p1156_p6 }
  0x49   : > { %v607_v0 = vld [vmem:[%s1020_s29 + $0x40] sm:$0xff]  ;;  %v608_v1 = vld [vmem:[%s1020_s29 + $0x48] sm:$0xff]  ;;  %v609_v5 = vld [vmem:[%s1020_s29 + $0x50] sm:$0xff]  ;;  %vm878_vm0 = vmmov 0   ;;  %vm418_vm1 = vcmask 130112   ;;  %vm425_vm2 = vcmask 195712  }
  0x4a   : > { %850 = vsyncadd (%p1157_p8), [#allocation6], 4294966784  ;;  %v203_v2 = vld [vmem:[%s1020_s29] sm:$0xff]  ;;  %v232_v3 = vadd.f32 %v608_v1, %v607_v0  ;;  %v204_v4 = vld [vmem:[%s1020_s29 + $0x8] sm:$0xff]  ;;  %vm432_vm3 = vcmask 261312   ;;  %vm434_vm4 = vcmask 261120  }
  0x4b   : > { %v610_v6 = vld [vmem:[%s1020_s29 + $0x58] sm:$0xff]  ;;  %v211_v7 = vadd.f32 %v204_v4, %v203_v2  ;;  %v205_v8 = vld [vmem:[%s1020_s29 + $0x10] sm:$0xff]  ;;  %v611_v12 = vld [vmem:[%s1020_s29 + $0x60] sm:$0xff]  ;;  %s664_s17 = sshll.u32 %s921_s16, 4  ;;  %s202_s22 = scalar_lea.vmem [#allocation7], %s1016_s26 }
  0x4c   : > { %v206_v9 = vld [vmem:[%s1020_s29 + $0x18] sm:$0xff]  ;;  %236 = vadd.xlane.f32.xlu1 %v232_v3  ;;  %v233_v10 = vadd.f32 %v610_v6, %v609_v5  ;;  %v612_v13 = vld [vmem:[%s1020_s29 + $0x68] sm:$0xff]  ;;  %v207_v14 = vld [vmem:[%s1020_s29 + $0x20] sm:$0xff]  ;;  %s521_s23 = sshll.u32 %s202_s22, 4  ;;  %s1102_s4 = scalar_lea.hbm %s1142_s3, %s664_s17  ;;  %s522_s23 = int_to_ptr.vmem [resolvable:$true] %s521_s23 }
  0x4d   : > { %215 = vadd.xlane.f32.xlu0 %v211_v7  ;;  %v212_v11 = vadd.f32 %v206_v9, %v205_v8  ;;  %v208_v15 = vld [vmem:[%s1020_s29 + $0x28] sm:$0xff]  ;;  %v234_v16 = vadd.f32 %v612_v13, %v611_v12  ;;  %v613_v18 = vld [vmem:[%s1020_s29 + $0x70] sm:$0xff]  ;;  %v614_v19 = vld [vmem:[%s1020_s29 + $0x78] sm:$0xff]  ;;  %s509_s7 = scalar_lea.sflag [#allocation4], %s1016_s26  ;;  %s801_s8 = scalar_lea.vmem %s522_s23, 16 }
  0x4e   : > { %v213_v17 = vadd.f32 %v208_v15, %v207_v14  ;;  %v209_v20 = vld [vmem:[%s1020_s29 + $0x30] sm:$0xff]  ;;  %v210_v21 = vld [vmem:[%s1020_s29 + $0x38] sm:$0xff]  ;;  %v235_v22 = vadd.f32 %v614_v19, %v613_v18  ;;  %v615_v26 = vld [vmem:[%s1020_s29 + $0x80] sm:$0xff]  ;;  %p802_p3 = scmp.ne.s32.totalorder %s522_s23, %s801_s8  ;;  %p1158_p11 = scmp.ne.s32.totalorder %s1152_s6, 0 }
  0x4f   : > { %v214_v23 = vadd.f32 %v210_v21, %v209_v20  ;;  %v617_v24 = vld [vmem:[%s1020_s29 + $0x90] sm:$0xff]  ;;  %v618_v25 = vld [vmem:[%s1020_s29 + $0x98] sm:$0xff]  ;;  %v616_v27 = vld [vmem:[%s1020_s29 + $0x88] sm:$0xff]  ;;  %s879_s9 = smov [#allocation7]  }
  0x50   : > { %238 = vadd.xlane.f32.xlu1 %v233_v10  ;;  %v258_v28 = vadd.f32 %v618_v25, %v617_v24  ;;  %v257_v29 = vadd.f32 %v616_v27, %v615_v26  ;;  %v621_v30 = vld [vmem:[%s1020_s29 + $0xb0] sm:$0xff]  ;;  %v622_v31 = vld [vmem:[%s1020_s29 + $0xb8] sm:$0xff]  ;;  %v619_v32 = vld [vmem:[%s1020_s29 + $0xa0] sm:$0xff]  ;;  %p803_p7 = pnand %p802_p3, %p1158_p11  ;;  %s805_s16 = sshll.u32 %s879_s9, 4  ;;  %s806_s16 = int_to_ptr.vmem [resolvable:$false] %s805_s16 }
  0x51   : > { %217 = vadd.xlane.f32.xlu0 %v212_v11  ;;  %v620_v33 = vld [vmem:[%s1020_s29 + $0xa8] sm:$0xff]  ;;  %v260_v34 = vadd.f32 %v622_v31, %v621_v30  ;;  %v625_v36 = vld [vmem:[%s1020_s29 + $0xd0] sm:$0xff]  ;;  %v626_v37 = vld [vmem:[%s1020_s29 + $0xd8] sm:$0xff]  ;;  %s807_s10 = scalar_lea.vmem %s806_s16, 32  ;;  %p808_p10 = scmp.lt.s32.totalorder %s522_s23, %s806_s16 }
  0x52   : > { %v259_v35 = vadd.f32 %v620_v33, %v619_v32  ;;  %v623_v38 = vld [vmem:[%s1020_s29 + $0xc0] sm:$0xff]  ;;  %v624_v39 = vld [vmem:[%s1020_s29 + $0xc8] sm:$0xff]  ;;  %v283_v40 = vadd.f32 %v626_v37, %v625_v36  ;;  %v629_v42 = vld [vmem:[%s1020_s29 + $0xf0] sm:$0xff]  ;;  %v877_v32 = vmov 0.0   ;;  %p804_p12 = pneg %p803_p7  ;;  %p809_p2 = scmp.lt.s32.totalorder %s807_s10, %s801_s8 }
  0x53   : > { %v282_v41 = vadd.f32 %v624_v39, %v623_v38  ;;  %v630_v43 = vld [vmem:[%s1020_s29 + $0xf8] sm:$0xff]  ;;  %v627_v44 = vld [vmem:[%s1020_s29 + $0xe0] sm:$0xff]  ;;  %v628_v45 = vld [vmem:[%s1020_s29 + $0xe8] sm:$0xff]  ;;  %673 = vmatprep.subr.mxu0 %v877_v32  ;;  %681 = vmatprep.mubr.msk.f32.mxu0 %vm878_vm0, %v877_v32 }
  0x54   : > { %240 = vadd.xlane.f32.xlu1 %v234_v16  ;;  %v285_v46 = vadd.f32 %v630_v43, %v629_v42  ;;  %v284_v47 = vadd.f32 %v628_v45, %v627_v44  ;;  %v633_v48 = vld [vmem:[%s1020_s29 + $0x110] sm:$0xff]  ;;  %v634_v49 = vld [vmem:[%s1020_s29 + $0x118] sm:$0xff]  ;;  %v631_v50 = vld [vmem:[%s1020_s29 + $0x100] sm:$0xff]  ;;  %p810_p13 = por %p809_p2, %p808_p10 }
  0x55   : > { %219 = vadd.xlane.f32.xlu0 %v213_v17  ;;  %v632_v51 = vld [vmem:[%s1020_s29 + $0x108] sm:$0xff]  ;;  %v308_v52 = vadd.f32 %v634_v49, %v633_v48  ;;  %v637_v54 = vld [vmem:[%s1020_s29 + $0x130] sm:$0xff]  ;;  %v638_v55 = vld [vmem:[%s1020_s29 + $0x138] sm:$0xff] }
  0x56   : > { %v307_v53 = vadd.f32 %v632_v51, %v631_v50  ;;  %v635_v56 = vld [vmem:[%s1020_s29 + $0x120] sm:$0xff]  ;;  %v636_v57 = vld [vmem:[%s1020_s29 + $0x128] sm:$0xff]  ;;  %v310_v58 = vadd.f32 %v638_v55, %v637_v54  ;;  %v641_v60 = vld [vmem:[%s1020_s29 + $0x150] sm:$0xff]  ;;  %p811_p0 = pnand %p810_p13, %p804_p12 }
  0x57   : > { %v309_v59 = vadd.f32 %v636_v57, %v635_v56  ;;  %v642_v61 = vld [vmem:[%s1020_s29 + $0x158] sm:$0xff]  ;;  %v639_v62 = vld [vmem:[%s1020_s29 + $0x140] sm:$0xff]  ;;  %v640_v63 = vld [vmem:[%s1020_s29 + $0x148] sm:$0xff] }
  0x58   : > { %242 = vadd.xlane.f32.xlu1 %v235_v22  ;;  %v333_v0 = vadd.f32 %v642_v61, %v641_v60  ;;  %v332_v1 = vadd.f32 %v640_v63, %v639_v62  ;;  %v645_v2 = vld [vmem:[%s1020_s29 + $0x170] sm:$0xff]  ;;  %v646_v3 = vld [vmem:[%s1020_s29 + $0x178] sm:$0xff]  ;;  %v643_v4 = vld [vmem:[%s1020_s29 + $0x160] sm:$0xff]  ;;  %v407_v62 = vlaneseq }
  0x59   : > { %221 = vadd.xlane.f32.xlu0 %v214_v23  ;;  %v644_v5 = vld [vmem:[%s1020_s29 + $0x168] sm:$0xff]  ;;  %v335_v6 = vadd.f32 %v646_v3, %v645_v2  ;;  %v649_v8 = vld [vmem:[%s1020_s29 + $0x190] sm:$0xff]  ;;  %v650_v9 = vld [vmem:[%s1020_s29 + $0x198] sm:$0xff] }
  0x5a   : > { %v334_v7 = vadd.f32 %v644_v5, %v643_v4  ;;  %v647_v10 = vld [vmem:[%s1020_s29 + $0x180] sm:$0xff]  ;;  %v648_v11 = vld [vmem:[%s1020_s29 + $0x188] sm:$0xff]  ;;  %v358_v12 = vadd.f32 %v650_v9, %v649_v8  ;;  %v653_v14 = vld [vmem:[%s1020_s29 + $0x1b0] sm:$0xff] }
  0x5b   : > { %v357_v13 = vadd.f32 %v648_v11, %v647_v10  ;;  %v654_v15 = vld [vmem:[%s1020_s29 + $0x1b8] sm:$0xff]  ;;  %v651_v16 = vld [vmem:[%s1020_s29 + $0x1a0] sm:$0xff]  ;;  %v652_v17 = vld [vmem:[%s1020_s29 + $0x1a8] sm:$0xff] }
  0x5c   : > { %263 = vadd.xlane.f32.xlu1 %v258_v28  ;;  %v360_v18 = vadd.f32 %v654_v15, %v653_v14  ;;  %v359_v19 = vadd.f32 %v652_v17, %v651_v16  ;;  %v657_v20 = vld [vmem:[%s1020_s29 + $0x1d0] sm:$0xff]  ;;  %v658_v21 = vld [vmem:[%s1020_s29 + $0x1d8] sm:$0xff]  ;;  %v655_v22 = vld [vmem:[%s1020_s29 + $0x1c0] sm:$0xff]  ;;  %v410_v17 = vshrl.u32 %v407_v62, 7 }
  0x5d   : > { %261 = vadd.xlane.f32.xlu0 %v257_v29  ;;  %v656_v23 = vld [vmem:[%s1020_s29 + $0x1c8] sm:$0xff]  ;;  %v383_v24 = vadd.f32 %v658_v21, %v657_v20  ;;  %v661_v26 = vld [vmem:[%s1020_s29 + $0x1f0] sm:$0xff]  ;;  %v662_v27 = vld [vmem:[%s1020_s29 + $0x1f8] sm:$0xff] }
  0x5e   : > { %v382_v25 = vadd.f32 %v656_v23, %v655_v22  ;;  %v659_v28 = vld [vmem:[%s1020_s29 + $0x1e0] sm:$0xff]  ;;  %v660_v29 = vld [vmem:[%s1020_s29 + $0x1e8] sm:$0xff]  ;;  %v385_v30 = vadd.f32 %v662_v27, %v661_v26  ;;  %v401_v33 = vld [vmem:[#allocation5 + $0x18] sm:$0xff] }
  0x5f   : > { %v384_v31 = vadd.f32 %v660_v29, %v659_v28  ;;  %674 = vmatpush3.msra.mxu0 %v401_v33  ;;  %v398_v36 = vld [vmem:[#allocation5] sm:$0xff] }
  0x60   : > { %267 = vadd.xlane.f32.xlu1 %v260_v34  ;;  %675 = vmatprep.subr.mxu0 %v877_v32  ;;  %v400_v34 = vld [vmem:[#allocation5 + $0x10] sm:$0xff] }
  0x61   : > { %265 = vadd.xlane.f32.xlu0 %v259_v35  ;;  %676 = vmatpush3.msra.mxu0 %v400_v34  ;;  %v399_v35 = vld [vmem:[#allocation5 + $0x8] sm:$0xff] }
  0x62   : > { %677 = vmatprep.subr.mxu0 %v877_v32 }
  0x63   : > { %678 = vmatpush3.msra.mxu0 %v399_v35 }
  0x64   : > { %288 = vadd.xlane.f32.xlu1 %v283_v40  ;;  %679 = vmatprep.subr.mxu0 %v877_v32 }
  0x65   : > { %286 = vadd.xlane.f32.xlu0 %v282_v41  ;;  %680 = vmatpush3.msra.mxu0 %v398_v36 }
  0x68   : > { %292 = vadd.xlane.f32.xlu1 %v285_v46 }
  0x69   : > { %290 = vadd.xlane.f32.xlu0 %v284_v47 }
  0x6c   : > { %313 = vadd.xlane.f32.xlu1 %v308_v52 }
  0x6d   : > { %311 = vadd.xlane.f32.xlu0 %v307_v53 }
  0x70   : > { %317 = vadd.xlane.f32.xlu1 %v310_v58 }
  0x71   : > { %315 = vadd.xlane.f32.xlu0 %v309_v59 }
  0x74   : > { %338 = vadd.xlane.f32.xlu1 %v333_v0 }
  0x75   : > { %336 = vadd.xlane.f32.xlu0 %v332_v1 }
  0x78   : > { %342 = vadd.xlane.f32.xlu1 %v335_v6  ;;  %v408_v6 = vand.u32 127, %v407_v62 }
  0x79   : > { %340 = vadd.xlane.f32.xlu0 %v334_v7 }
  0x7a   : > { %v427_v23 = vadd.s32 4294967272, %v408_v6  ;;  %v420_v27 = vadd.s32 4294967280, %v408_v6 }
  0x7c   : > { %363 = vadd.xlane.f32.xlu1 %v358_v12  ;;  %v430_v36 = vsub.s32 %v427_v23, %v410_v17 }
  0x7d   : > { %361 = vadd.xlane.f32.xlu0 %v357_v13 }
  0x80   : > { %367 = vadd.xlane.f32.xlu1 %v360_v18  ;;  %v413_v18 = vadd.s32 4294967288, %v408_v6 }
  0x81   : > { %365 = vadd.xlane.f32.xlu0 %v359_v19 }
  0x82   : > { %v416_v29 = vsub.s32 %v413_v18, %v410_v17 }
  0x84   : > { %388 = vadd.xlane.f32.xlu1 %v383_v24 }
  0x85   : > { %386 = vadd.xlane.f32.xlu0 %v382_v25 }
  0x88   : > { %392 = vadd.xlane.f32.xlu1 %v385_v30 }
  0x89   : > { %390 = vadd.xlane.f32.xlu0 %v384_v31  ;;  %v411_v31 = vsub.s32 %v408_v6, %v410_v17 }
  0xd5   : > { %v237_v37 = vpop.xlane.xlu1 %236 }
  0xd6   : > { %v216_v38 = vpop.xlane.xlu0 %215 }
  0xd7   : > { %v244_v63 = vmax.f32 %v216_v38, %v237_v37 }
  0xd9   : > { %v239_v39 = vpop.xlane.xlu1 %238 }
  0xda   : > { %v218_v40 = vpop.xlane.xlu0 %217 }
  0xdb   : > { %v245_v60 = vmax.f32 %v218_v40, %v239_v39  ;;  %v423_v39 = vsub.s32 %v420_v27, %v410_v17 }
  0xdd   : > { %v241_v41 = vpop.xlane.xlu1 %240 }
  0xde   : > { %v220_v42 = vpop.xlane.xlu0 %219 }
  0xdf   : > { %v246_v7 = vmax.f32 %v220_v42, %v241_v41 }
  0xe1   : > { %v243_v43 = vpop.xlane.xlu1 %242 }
  0xe2   : > { %v222_v44 = vpop.xlane.xlu0 %221 }
  0xe3   : > { %v247_v3 = vmax.f32 %v222_v44, %v243_v43 }
  0xe5   : > { %v264_v45 = vpop.xlane.xlu1 %263 }
  0xe6   : > { %v262_v46 = vpop.xlane.xlu0 %261  ;;  %v270_v0 = vmax.f32 %v245_v60, %v264_v45 }
  0xe7   : > { %v269_v1 = vmax.f32 %v244_v63, %v262_v46 }
  0xe9   : > { %v268_v47 = vpop.xlane.xlu1 %267 }
  0xea   : > { %v266_v48 = vpop.xlane.xlu0 %265  ;;  %v272_v9 = vmax.f32 %v247_v3, %v268_v47 }
  0xeb   : > { %v271_v11 = vmax.f32 %v246_v7, %v266_v48 }
  0xed   : > { %v289_v49 = vpop.xlane.xlu1 %288 }
  0xee   : > { %v287_v50 = vpop.xlane.xlu0 %286  ;;  %v295_v4 = vmax.f32 %v270_v0, %v289_v49 }
  0xef   : > { %v294_v8 = vmax.f32 %v269_v1, %v287_v50  ;;  %v402_v50 = vld [vmem:[%s1141_s2] sm:$0x1] }
  0xf1   : > { %v293_v51 = vpop.xlane.xlu1 %292 }
  0xf2   : > { %v291_v52 = vpop.xlane.xlu0 %290  ;;  %v297_v14 = vmax.f32 %v272_v9, %v293_v51 }
  0xf3   : > { %v296_v19 = vmax.f32 %v271_v11, %v291_v52 }
  0xf5   : > { %v314_v53 = vpop.xlane.xlu1 %313 }
  0xf6   : > { %v312_v54 = vpop.xlane.xlu0 %311  ;;  %v320_v10 = vmax.f32 %v295_v4, %v314_v53 }
  0xf7   : > { %v319_v12 = vmax.f32 %v294_v8, %v312_v54 }
  0xf9   : > { %v318_v55 = vpop.xlane.xlu1 %317 }
  0xfa   : > { %v316_v56 = vpop.xlane.xlu0 %315  ;;  %v322_v21 = vmax.f32 %v297_v14, %v318_v55 }
  0xfb   : > { %v321_v24 = vmax.f32 %v296_v19, %v316_v56 }
  0xfd   : > { %v339_v57 = vpop.xlane.xlu1 %338 }
  0xfe   : > { %v337_v58 = vpop.xlane.xlu0 %336  ;;  %v345_v15 = vmax.f32 %v320_v10, %v339_v57 }
  0xff   : > { %v344_v20 = vmax.f32 %v319_v12, %v337_v58 }
 0x101   : > { %v343_v59 = vpop.xlane.xlu1 %342 }
 0x102   : > { %v341_v61 = vpop.xlane.xlu0 %340  ;;  %v347_v28 = vmax.f32 %v322_v21, %v343_v59 }
 0x103   : > { %v346_v33 = vmax.f32 %v321_v24, %v341_v61 }
 0x105   : > { %v364_v2 = vpop.xlane.xlu1 %363 }
 0x106   : > { %v362_v5 = vpop.xlane.xlu0 %361  ;;  %v370_v22 = vmax.f32 %v345_v15, %v364_v2 }
 0x107   : > { %v369_v25 = vmax.f32 %v344_v20, %v362_v5 }
 0x109   : > { %v368_v13 = vpop.xlane.xlu1 %367 }
 0x10a   : > { %v366_v16 = vpop.xlane.xlu0 %365  ;;  %v372_v35 = vmax.f32 %v347_v28, %v368_v13 }
 0x10b   : > { %v371_v37 = vmax.f32 %v346_v33, %v366_v16 }
 0x10d   : > { %v389_v26 = vpop.xlane.xlu1 %388 }
 0x10e   : > { %v395_v30 = vmax.f32 %v370_v22, %v389_v26  ;;  %v387_v32 = vpop.xlane.xlu0 %386 }
 0x10f   : > { %v394_v34 = vmax.f32 %v369_v25, %v387_v32 }
 0x110   : > { %v417_v40 = vrot.slane %v395_v30, %v416_v29 }
 0x111   : > { %v393_v38 = vpop.xlane.xlu1 %392  ;;  %v412_v41 = vrot.slane %v394_v34, %v411_v31 }
 0x112   : > { %v397_v42 = vmax.f32 %v372_v35, %v393_v38  ;;  %v391_v43 = vpop.xlane.xlu0 %390 }
 0x113   : > { %v396_v44 = vmax.f32 %v371_v37, %v391_v43  ;;  %v419_v47 = vsel %vm418_vm1, %v417_v40, %v412_v41 }
 0x114   : > { %v431_v45 = vrot.slane %v397_v42, %v430_v36 }
 0x115   : > { %v424_v46 = vrot.slane %v396_v44, %v423_v39 }
 0x117   : > { %v426_v48 = vsel %vm425_vm2, %v424_v46, %v419_v47 }
 0x118   : > { %v433_v49 = vsel %vm432_vm3, %v431_v45, %v426_v48 }
 0x119   : > { %682 = vmatmul.mubr.msk.f32.vlgmr.msra.gmra.mxu0 %vm434_vm4, %v433_v49 }
 0x1d9   : > { %v503_v51 = vpop.f32.mrf.mxu0 }
 0x1da   : > { %v504_v52 = vadd.f32 %v503_v51, %v402_v50 }
 0x1db   : > { %v683_v53 = vpop.f32.mrf.mxu0 }
 0x1dc   : > { %507 = vst [vmem:[%s202_s22] sm:$0x1] %v504_v52 }
 0x1dd   : > { %814 = shalt.err (!%p811_p0)
}
 0x1de   : > { %s815_s11 = scalar_lea.hbm %s1102_s4, 16  ;;  %s819_s27 = scalar_lea.hbm %s1142_s3, 32 }
 0x1df   : > { %p816_p5 = scmp.ne.s32.totalorder %s1102_s4, %s815_s11  ;;  %p820_p4 = scmp.lt.s32.totalorder %s1102_s4, %s1142_s3 }
 0x1e0   : > { %p821_p6 = scmp.lt.s32.totalorder %s819_s27, %s815_s11 }
 0x1e1   : > { %p817_p9 = pnand %p816_p5, %p1158_p11 }
 0x1e2   : > { %p822_p8 = por %p821_p6, %p820_p4 }
 0x1e3   : > { %p818_p1 = pneg %p817_p9 }
 0x1e5   : > { %p823_p3 = pnand %p822_p8, %p818_p1 }
 0x1e7   : > { %826 = shalt.err (!%p823_p3)
}
 0x1e8   : > { %690 = dma.vmem_to_hbm [thread:$0]  (%p1158_p11), %s522_s23, 16, %s1102_s4, %s509_s7  }
 0x1e9 PF: > { %s533_s18 = sand.u32 1, %s857_s12   ;;  %p1159_p7 = scmp.ne.s32.totalorder %s1148_s19, 0 }
 0x1ea   : > { %p1160_p12 = scmp.ge.s32.totalorder %s869_s15, 2  ;;  %s534_s20 = scalar_lea.sflag [#allocation4], %s533_s18 }
 0x1ec   : > { %p701_p10 = pnand %p1160_p12, %p1159_p7 }
 0x1ee   : > { %p702_p2 = pneg %p701_p10 }
 0x1f0   : > { %852 = dma.done.wait (%p702_p2), %s534_s20, 16  }
 0x1f1   : > { %854 = vsyncadd (%p702_p2), %s534_s20, 4294967280  ;;  %p17_p13 = scmp.ge.s32.totalorder %s954_s24, 4   ;;  %s1161_s12 = smov %s861_s13 }
 0x1f2   : > { %s1162_s13 = smov %s865_s14  ;;  %s1163_s14 = smov %s971_s5 }
 0x1f3   : > { %s1164_s15 = smov %s954_s24  ;;  %19 = sbr.rel (!%p17_p13) target bundleno = 6 (0x6), region = 88 }
 0x1f8   :  { %538 = vsyncpa [#allocation3], 1 }
 0x1f9   :  { %540 = vsyncpa [#allocation3 + $0x1], 1 }
 0x1fa   :  { %541 = vsyncpa [#allocation6], 1 }
 0x1fb   :  { %542 = vsyncpa [#allocation4], 1 }
 0x1fc   :  { %544 = vsyncpa [#allocation4 + $0x1], 1 }

</bundles_post_ra>
